<compile_context>
chip_gen: v6e
topology: v6e:2x2x1
jax: 0.10.0
libtpu: 0.0.40
codegen_flags: <defaults>
</compile_context>

<pallas_src>
import jax
import jax.numpy as jnp
from jax.experimental import pallas as pl
from jax.experimental.pallas import tpu as pltpu


def _cdiv(a, b):
    return -(-a // b)


def _round_up(x, m):
    return _cdiv(x, m) * m


def _vmem_capacity_bytes():
    try:
        return int(pltpu.get_tpu_info().vmem_capacity_bytes)
    except Exception:
        return 64 << 20  # conservative (v7x-sized) fallback


def _mono_kernel_dense(fac_ref, x_ref, o_ref):
    # fac_ref: SMEM (C,) f32 scalars.
    # x_ref:   VMEM (1, C, R, 128) input block; channel is a MAJOR dim, so the
    #          per-channel slices below are tile-aligned (no sublane relayout).
    # o_ref:   VMEM (1, 1, R, 128) lane- and sublane-dense output block.
    C = x_ref.shape[1]
    acc = fac_ref[0] * x_ref[0, 0].astype(jnp.float32)
    for c in range(1, C):  # C is tiny (3): a short fused VPU mul-add chain.
        acc = acc + fac_ref[c] * x_ref[0, c].astype(jnp.float32)
    o_ref[0, 0] = acc.astype(o_ref.dtype)


def _mono_kernel_ragged(fac_ref, x_ref, o_ref):
    # fac_ref: VMEM (C, 1) f32 weights (lane broadcast; avoids sublane slices).
    # x_ref:   VMEM (1, C, T) input block.
    # o_ref:   VMEM (1, 1, T) lane-dense output block.
    x = x_ref[0].astype(jnp.float32)        # (C, T)
    w = fac_ref[...]                        # (C, 1) -> broadcast over lanes
    o_ref[0, 0] = jnp.sum(x * w, axis=0).astype(o_ref.dtype)  # sublane reduce


def to_monochrome(x, factors, *, out_dtype=None, tile_elems=None):
    """sum_c(factors[c] * x[:, c]) with keepdim -> (N, 1, H, W)."""
    N, C, H, W = x.shape
    factors = jnp.asarray(factors, jnp.float32)
    if factors.shape != (C,):
        raise ValueError("channel count must match number of factors")
    if out_dtype is None:
        # Match PyTorch promotion (data * f32 factors -> f32).  Callers may
        # override (e.g. bf16) to halve the writeback traffic.
        out_dtype = jnp.result_type(x.dtype, jnp.float32)

    hw = H * W
    in_item = jnp.dtype(x.dtype).itemsize
    out_item = jnp.dtype(out_dtype).itemsize
    # Sublane granularity of the packed input dtype (8 f32 / 16 bf16 / 32 i8).
    sub = max(8, 32 // in_item)

    vmem_cap = _vmem_capacity_bytes()
    if tile_elems is None:
        # ~1M spatial elems (~32 MiB double-buffered, f32) on 128-MiB-VMEM
        # parts (v5e/v6e), ~512K (~16 MiB double-buffered) on 64-MiB v7x.
        tile_elems = (1 << 20) if vmem_cap >= (100 << 20) else (512 * 1024)
    wanted_tiles = _cdiv(4, N)  # keep >= ~4 grid steps so both v7x TCs get work

    cost = pl.CostEstimate(
        flops=2 * N * C * hw,  # one mul + one add per channel element
        transcendentals=0,
        bytes_accessed=N * C * hw * in_item + N * hw * out_item,
    )

    def _params(block_elems):
        blk_bytes = block_elems * (C * in_item + out_item)
        vmem_limit = int(min(max(32 << 20, 3 * blk_bytes), (vmem_cap * 3) // 4))
        return pltpu.CompilerParams(
            dimension_semantics=("parallel", "parallel"),
            vmem_limit_bytes=vmem_limit,
        )

    if hw % 128 == 0:
        # Dense path: (8,128)-dense blocks, unmasked stores, no pad/slice.
        rows = hw // 128
        r_max = max(sub, (tile_elems // 128) // sub * sub)
        if rows <= sub:
            r = rows  # block equals the full dim
        else:
            r = min(r_max, _round_up(_cdiv(rows, wanted_tiles), sub))
            r = max(sub, min(r, (rows // sub) * sub))
        num_tiles = _cdiv(rows, r)

        xr = x.reshape(N, C, rows, 128)
        out = pl.pallas_call(
            _mono_kernel_dense,
            out_shape=jax.ShapeDtypeStruct((N, 1, rows, 128), out_dtype),
            grid=(N, num_tiles),
            in_specs=[
                pl.BlockSpec(memory_space=pltpu.MemorySpace.SMEM),       # factors
                pl.BlockSpec((1, C, r, 128), lambda b, t: (b, 0, t, 0)),
            ],
            out_specs=pl.BlockSpec((1, 1, r, 128), lambda b, t: (b, 0, t, 0)),
            compiler_params=_params(r * 128),
            cost_estimate=cost,
        )(factors, xr)
        return out.reshape(N, 1, H, W)

    # Ragged fallback: flat spatial axis, lane-dense tiles, masked edge block.
    t_max = max(128, (tile_elems // 128) * 128)
    if hw <= 128:
        t = hw  # block equals the full dim
    else:
        t = min(t_max, _round_up(_cdiv(hw, wanted_tiles), 128))
        t = max(128, min(t, (hw // 128) * 128))
    num_tiles = _cdiv(hw, t)

    xf = x.reshape(N, C, hw)
    out = pl.pallas_call(
        _mono_kernel_ragged,
        out_shape=jax.ShapeDtypeStruct((N, 1, hw), out_dtype),
        grid=(N, num_tiles),
        in_specs=[
            pl.BlockSpec((C, 1), lambda b, t_: (0, 0)),      # factors (VMEM)
            pl.BlockSpec((1, C, t), lambda b, t_: (b, 0, t_)),
        ],
        out_specs=pl.BlockSpec((1, 1, t), lambda b, t_: (b, 0, t_)),
        compiler_params=_params(t),
        cost_estimate=cost,
    )(factors.reshape(C, 1), xf)
    return out.reshape(N, 1, H, W)


if __name__ == "__main__":
    key = jax.random.PRNGKey(0)
    k1, k2, k3, k4, k5 = jax.random.split(key, 5)
    # Default luma factors of the PyTorch module.
    factors = jnp.array([0.2126, 0.7152, 0.0722], dtype=jnp.float32)

    def ref(x):
        return jnp.sum(x.astype(jnp.float32) * factors[None, :, None, None],
                       axis=1, keepdims=True)

    # 1) Dense path (hw % 128 == 0), single tile per image.
    x1 = jax.random.normal(k1, (2, 3, 16, 16), dtype=jnp.float32)
    o1 = jax.block_until_ready(to_monochrome(x1, factors))
    assert o1.shape == (2, 1, 16, 16) and o1.dtype == jnp.float32, (o1.shape, o1.dtype)
    assert jnp.allclose(o1, ref(x1), atol=1e-5, rtol=1e-5), "mismatch (dense)"

    # 2) Dense path, multi-tile ragged grid (rows=20, R=8 -> 3 tiles, last ragged).
    x2 = jax.random.normal(k2, (1, 3, 40, 64), dtype=jnp.float32)
    o2 = jax.block_until_ready(to_monochrome(x2, factors, tile_elems=1024))
    assert o2.shape == (1, 1, 40, 64), o2.shape
    assert jnp.allclose(o2, ref(x2), atol=1e-5, rtol=1e-5), "mismatch (dense multi-tile)"

    # 3) Ragged fallback, hw < 128 (single full-dim tile).
    x3 = jax.random.normal(k3, (2, 3, 7, 9), dtype=jnp.float32)
    o3 = jax.block_until_ready(to_monochrome(x3, factors))
    assert o3.shape == (2, 1, 7, 9), o3.shape
    assert jnp.allclose(o3, ref(x3), atol=1e-5, rtol=1e-5), "mismatch (ragged small)"

    # 4) Ragged fallback, multi-tile with masked edge block (hw=153, T=128).
    x4 = jax.random.normal(k4, (2, 3, 9, 17), dtype=jnp.float32)
    o4 = jax.block_until_ready(to_monochrome(x4, factors, tile_elems=128))
    assert o4.shape == (2, 1, 9, 17), o4.shape
    assert jnp.allclose(o4, ref(x4), atol=1e-5, rtol=1e-5), "mismatch (ragged multi-tile)"

    # 5) bf16 input: f32 accumulation/output by default; optional bf16 output.
    x5 = jax.random.normal(k5, (2, 3, 16, 16), dtype=jnp.bfloat16)
    o5 = jax.block_until_ready(to_monochrome(x5, factors))
    assert o5.dtype == jnp.float32, o5.dtype
    assert jnp.allclose(o5, ref(x5), atol=1e-4, rtol=1e-4), "mismatch (bf16 in)"
    o5b = jax.block_until_ready(to_monochrome(x5, factors, out_dtype=jnp.bfloat16))
    assert o5b.dtype == jnp.bfloat16, o5b.dtype
    assert jnp.allclose(o5b.astype(jnp.float32), ref(x5), atol=2e-2, rtol=2e-2), \
        "mismatch (bf16 out)"

    print("KERNEL_OK")
</pallas_src>

<mosaic_0001>
module attributes {stable_mosaic.version = 11 : i64} {
  func.func @_mono_kernel_dense(%arg0: i32, %arg1: i32, %arg2: memref<3xf32, #tpu.memory_space<smem>>, %arg3: memref<1x3x2x128xf32, #tpu.memory_space<vmem>>, %arg4: memref<1x1x2x128xf32, #tpu.memory_space<vmem>>) attributes {dimension_semantics = [#tpu.dimension_semantics<parallel>, #tpu.dimension_semantics<parallel>], iteration_bounds = array<i64: 2, 1>, scalar_prefetch = 0 : i64, scratch_operands = 0 : i64, tpu.core_type = #tpu.core_type<tc>, window_params = [{transform_indices = @transform_0, window_bounds = array<i64: 3>}, {transform_indices = @transform_1, window_bounds = array<i64: 1, 3, 2, 128>}, {transform_indices = @transform_2, window_bounds = array<i64: 1, 1, 2, 128>}]} {
    %c0 = arith.constant 0 : index
    %0 = memref.load %arg2[%c0] : memref<3xf32, #tpu.memory_space<smem>>
    %c0_0 = arith.constant 0 : index
    %c0_1 = arith.constant 0 : index
    %c0_2 = arith.constant 0 : index
    %c0_3 = arith.constant 0 : index
    %1 = vector.load %arg3[%c0_0, %c0_1, %c0_2, %c0_3] : memref<1x3x2x128xf32, #tpu.memory_space<vmem>>, vector<1x1x2x128xf32>
    %2 = vector.shape_cast %1 : vector<1x1x2x128xf32> to vector<2x128xf32>
    %3 = vector.broadcast %0 : f32 to vector<2x128xf32>
    %4 = arith.mulf %3, %2 : vector<2x128xf32>
    %c1 = arith.constant 1 : index
    %5 = memref.load %arg2[%c1] : memref<3xf32, #tpu.memory_space<smem>>
    %c0_4 = arith.constant 0 : index
    %c1_5 = arith.constant 1 : index
    %c0_6 = arith.constant 0 : index
    %c0_7 = arith.constant 0 : index
    %6 = vector.load %arg3[%c0_4, %c1_5, %c0_6, %c0_7] : memref<1x3x2x128xf32, #tpu.memory_space<vmem>>, vector<1x1x2x128xf32>
    %7 = vector.shape_cast %6 : vector<1x1x2x128xf32> to vector<2x128xf32>
    %8 = vector.broadcast %5 : f32 to vector<2x128xf32>
    %9 = arith.mulf %8, %7 : vector<2x128xf32>
    %10 = arith.addf %4, %9 : vector<2x128xf32>
    %c2 = arith.constant 2 : index
    %11 = memref.load %arg2[%c2] : memref<3xf32, #tpu.memory_space<smem>>
    %c0_8 = arith.constant 0 : index
    %c2_9 = arith.constant 2 : index
    %c0_10 = arith.constant 0 : index
    %c0_11 = arith.constant 0 : index
    %12 = vector.load %arg3[%c0_8, %c2_9, %c0_10, %c0_11] : memref<1x3x2x128xf32, #tpu.memory_space<vmem>>, vector<1x1x2x128xf32>
    %13 = vector.shape_cast %12 : vector<1x1x2x128xf32> to vector<2x128xf32>
    %14 = vector.broadcast %11 : f32 to vector<2x128xf32>
    %15 = arith.mulf %14, %13 : vector<2x128xf32>
    %16 = arith.addf %10, %15 : vector<2x128xf32>
    %c0_12 = arith.constant 0 : index
    %c0_13 = arith.constant 0 : index
    %c0_14 = arith.constant 0 : index
    %c0_15 = arith.constant 0 : index
    %17 = vector.load %arg4[%c0_12, %c0_13, %c0_14, %c0_15] : memref<1x1x2x128xf32, #tpu.memory_space<vmem>>, vector<1x1x2x128xf32>
    %18 = vector.shape_cast %17 : vector<1x1x2x128xf32> to vector<2x128xf32>
    %19 = vector.shape_cast %16 : vector<2x128xf32> to vector<1x1x2x128xf32>
    tpu.vector_store %arg4[%c0_12, %c0_13, %c0_14, %c0_15], %19 {strides = array<i32>} : memref<1x1x2x128xf32, #tpu.memory_space<vmem>>, vector<1x1x2x128xf32>,
    return
  }
  func.func @transform_0(%arg0: i32, %arg1: i32) -> i32 {
    %c0_i32 = arith.constant 0 : i32
    %c0_i32_0 = arith.constant 0 : i32
    return %c0_i32 : i32
  }
  func.func @transform_1(%arg0: i32, %arg1: i32) -> (i32, i32, i32, i32) {
    %c0_i32 = arith.constant 0 : i32
    %c0_i32_0 = arith.constant 0 : i32
    %c0_i32_1 = arith.constant 0 : i32
    return %arg0, %c0_i32, %arg1, %c0_i32_0 : i32, i32, i32, i32
  }
  func.func @transform_2(%arg0: i32, %arg1: i32) -> (i32, i32, i32, i32) {
    %c0_i32 = arith.constant 0 : i32
    %c0_i32_0 = arith.constant 0 : i32
    %c0_i32_1 = arith.constant 0 : i32
    return %arg0, %c0_i32, %arg1, %c0_i32_0 : i32, i32, i32, i32
  }
}

</mosaic_0001>

<bundles_post_ra>
// kernel: tpu_custom_call.1
= control target key start
LH: loop header
LB: loop body
LE: loop exit
PB: predicated region body
PF: predicated region fallthrough
CT: control target
= control target key end

     0   :  { %7 = vsyncpa [#allocation5], 0  ;;  %s712_s0 = inlined_call_operand.hbm [shape: f32[3], index: 0, kind: input, shape index: {}]   ;;  %s713_s1 = inlined_call_operand.hbm [shape: f32[2,3,2,128], index: 1, kind: input, shape index: {}]   ;;  %s714_s2 = inlined_call_operand.hbm [shape: f32[2,1,2,128], index: 2, kind: output, shape index: {}]  }
   0x1   :  { %8 = vsyncpa [#allocation3], 0 }
   0x2   :  { %10 = vsyncpa [#allocation3 + $0x1], 0 }
   0x3   :  { %11 = vsyncpa [#allocation4], 0 }
   0x4   :  { %13 = vsyncpa [#allocation4 + $0x1], 0  ;;  %s556_s9 = smov 0   ;;  %s558_s10 = smov 0  }
   0x5   :  { %s560_s11 = smov 0   ;;  %s562_s12 = smov 0  }
   0x6   :  { %s564_s13 = smov 0   ;;  %s566_s14 = smov 0  }
   0x7 LB: > { %s316_s15 = sadd.s32 4294967295, %s534_s14   ;;  %s317_s16 = sadd.s32 4294967294, %s534_s14   ;;  %s534_s14 = sphi %s566_s14, %s19_s14   ;;  %s530_s13 = sphi %s564_s13, %s727_s13   ;;  %s526_s12 = sphi %s562_s12, %s726_s12   ;;  %s522_s11 = sphi %s560_s11, %s725_s11   ;;  %s518_s10 = sphi %s558_s10, %s724_s10   ;;  %s514_s9 = sphi %s556_s9, %s723_s9  }
   0x8   : > { %s61_s17 = sadd.s32 1, %s522_s11  ;;  %p68_p0 = scmp.ne.s32.totalorder %s522_s11, %s518_s10 }
   0x9   : > { %p69_p1 = scmp.eq.s32.totalorder %s534_s14, 0  ;;  %p74_p2 = scmp.ne.s32.totalorder %s518_s10, %s514_s9 }
   0xa   : > { %p594_p3 = scmp.eq.s32.totalorder %s316_s15, 0  ;;  %p100_p4 = scmp.eq.s32.totalorder %s316_s15, 1 }
   0xb   : > { %p70_p5 = por %p69_p1, %p68_p0  ;;  %p106_p6 = scmp.eq.s32.totalorder %s317_s16, 1 }
   0xc   : > { %p600_p7 = por %p594_p3, %p74_p2  ;;  %p604_p8 = por %p100_p4, %p68_p0 }
   0xd   : > { %p608_p9 = por %p106_p6, %p74_p2  ;;  %p318_p10 = scmp.ge.s32.totalorder %s534_s14, 1 }
   0xe   : > { %p113_p11 = scmp.lt.s32.totalorder %s534_s14, 3  ;;  %p357_p1 = scmp.lt.s32.totalorder %s534_s14, 2 }
   0xf   : > { %s718_s21 = scalar_select %p608_p9, 1, 0 }
  0x10   : > { %p615_p13 = pnand %p318_p10, %p113_p11  ;;  %s135_s23 = sand.u32 1, %s522_s11  }
  0x11   : > { %p623_p2 = pnand %p357_p1, %p70_p5  ;;  %s31_s25 = sadd.s32 1, %s530_s13 }
  0x12   : > { %p344_p0 = pneg %p615_p13  ;;  %s333_s26 = smul.u32 6, %s135_s23 }
  0x13   : > { %p33_p6 = scmp.ge.s32.totalorder %s31_s25, 2  ;;  %s536_s27 = smov [#allocation2]  }
  0x14   : > { %p345_p4 = pnand %p344_p0, %p594_p3  ;;  %s334_s30 = smul.u32 96, %s530_s13 }
  0x15   : > { %s729_s25 = smov (%p33_p6, %s31_s25), 0  ;;  %s139_s4 = scalar_lea.vmem [#allocation6], %s333_s26 }
  0x16   : > { %347 = dma.hbm_to_smem (!%p345_p4), %s712_s0, 16, %s536_s27, [#allocation5]  }
  0x17   : > { %s56_s3 = ssub.s32 %s530_s13, %s729_s25  ;;  %s147_s5 = sshll.u32 %s139_s4, 4  ;;  %s148_s5 = int_to_ptr.vmem [resolvable:$true] %s147_s5 }
  0x18   : > { %p59_p5 = scmp.eq.s32.totalorder %s56_s3, 0  ;;  %s146_s8 = scalar_lea.hbm %s713_s1, %s334_s30 }
  0x19   : > { %s136_s16 = scalar_lea.sflag [#allocation3], %s135_s23  ;;  %p424_p10 = pneg %p623_p2 }
  0x1a   : > { %s644_s15 = scalar_select %p59_p5, %s522_s11, %s61_s17  }
  0x1b   : > { %s435_s27 = scalar_lea.vmem %s148_s5, 96  ;;  %s537_s28 = smov [#allocation6]  }
  0x1c   : > { %p436_p11 = scmp.ne.s32.totalorder %s148_s5, %s435_s27  ;;  %s440_s29 = sshll.u32 %s537_s28, 4  ;;  %s441_s29 = int_to_ptr.vmem [resolvable:$false] %s440_s29 }
  0x1d   : > { %s442_s26 = scalar_lea.vmem %s441_s29, 192  ;;  %p443_p4 = scmp.lt.s32.totalorder %s148_s5, %s441_s29 }
  0x1e   : > { %p438_p1 = pnand %p436_p11, %p424_p10  ;;  %p444_p6 = scmp.lt.s32.totalorder %s442_s26, %s435_s27 }
  0x20   : > { %p439_p0 = pneg %p438_p1  ;;  %p445_p12 = por %p444_p6, %p443_p4 }
  0x22   : > { %p446_p9 = pnand %p445_p12, %p439_p0 }
  0x24   : > { %449 = shalt.err (!%p446_p9)
}
  0x25   : > { %s538_s30 = smov 32   ;;  %s539_s17 = smov 2  }
  0x26   : > { %351 = dma.hbm_to_vmem [thread:$0]  (!%p623_p2), %s146_s8, 96, %s148_s5, %s136_s16, %s538_s30, %s538_s30, %s539_s17  }
  0x27   : > { %159 = sbr.rel (%p615_p13) target bundleno = 79 (0x4f), region = 28 }
  0x2c   : > { %501 = dma.done.wait (%p594_p3), [#allocation5], 16  }
  0x2d   : > { %503 = vsyncadd (%p594_p3), [#allocation5], 4294967280  ;;  %s657_s23 = sand.u32 1, %s518_s10  }
  0x2e   : > { %s335_s3 = smul.u32 6, %s657_s23  ;;  %s166_s4 = scalar_lea.sflag [#allocation3], %s657_s23 }
  0x30   : > { %s169_s6 = scalar_lea.vmem [#allocation6], %s335_s3 }
  0x31   : > { %505 = dma.done.wait (%p600_p7), %s166_s4, 96  }
  0x32   : > { %507 = vsyncadd (%p600_p7), %s166_s4, 4294967200 }
  0x33   : > { %174 = sfence }
  0x34   : > { %s191_s22 = sld [smem:[#allocation2]]  ;;  %s324_s24 = sshll.u32 %s657_s23, 1  ;;  %v192_v0 = vld [vmem:[%s169_s6] sm:$0x3]  ;;  %v326_v1 = vld [vmem:[%s169_s6 + $0x2] sm:$0x3] }
  0x35   : > { %s325_s18 = sld [smem:[#allocation2 + $0x1]]  ;;  %v328_v3 = vld [vmem:[%s169_s6 + $0x4] sm:$0x3]  ;;  %s190_s7 = scalar_lea.vmem [#allocation7], %s324_s24 }
  0x36   : > { %s327_s5 = sld [smem:[#allocation2 + $0x2]]  ;;  %s223_s19 = sshll.u32 %s190_s7, 4  ;;  %s667_s19 = int_to_ptr.vmem [resolvable:$true] %s223_s19 }
  0x37   : > { %s330_s8 = sshll.u32 %s526_s12, 5  ;;  %s209_s29 = scalar_lea.sflag [#allocation4], %s657_s23 }
  0x38   : > { %s221_s28 = scalar_lea.hbm %s714_s2, %s330_s8  ;;  %s450_s26 = scalar_lea.vmem %s667_s19, 32 }
  0x39   : > { %p451_p3 = scmp.ne.s32.totalorder %s667_s19, %s450_s26  ;;  %s540_s30 = smov [#allocation7]  }
  0x3a   : > { %v193_v2 = vstv %s191_s22  ;;  %s454_s12 = sshll.u32 %s540_s30, 4  ;;  %s455_s12 = int_to_ptr.vmem [resolvable:$false] %s454_s12 }
  0x3b   : > { %v194_v4 = vmul.f32 %v193_v2, %v192_v0  ;;  %v198_v5 = vstv %s325_s18  ;;  %p452_p7 = pnand %p451_p3, %p604_p8  ;;  %s456_s17 = scalar_lea.vmem %s455_s12, 64 }
  0x3c   : > { %v199_v6 = vmul.f32 %v326_v1, %v198_v5  ;;  %v204_v7 = vstv %s327_s5  ;;  %p457_p12 = scmp.lt.s32.totalorder %s667_s19, %s455_s12  ;;  %p458_p13 = scmp.lt.s32.totalorder %s456_s17, %s450_s26 }
  0x3d   : > { %v205_v8 = vmul.f32 %v328_v3, %v204_v7  ;;  %p453_p9 = pneg %p452_p7 }
  0x3e   : > { %v200_v9 = vadd.f32 %v199_v6, %v194_v4  ;;  %p459_p2 = por %p458_p13, %p457_p12 }
  0x40   : > { %v206_v10 = vadd.f32 %v205_v8, %v200_v9  ;;  %p460_p5 = pnand %p459_p2, %p453_p9 }
  0x42   : > { %207 = vst [vmem:[%s190_s7] sm:$0x3] %v206_v10 }
  0x43   : > { %463 = shalt.err (!%p460_p5)
}
  0x44   : > { %s464_s3 = scalar_lea.hbm %s221_s28, 32  ;;  %s468_s6 = scalar_lea.hbm %s714_s2, 64 }
  0x45   : > { %p465_p10 = scmp.ne.s32.totalorder %s221_s28, %s464_s3  ;;  %p469_p0 = scmp.lt.s32.totalorder %s221_s28, %s714_s2 }
  0x46   : > { %p470_p4 = scmp.lt.s32.totalorder %s468_s6, %s464_s3 }
  0x47   : > { %p466_p11 = pnand %p465_p10, %p604_p8 }
  0x48   : > { %p471_p6 = por %p470_p4, %p469_p0 }
  0x49   : > { %p467_p1 = pneg %p466_p11 }
  0x4b   : > { %p472_p3 = pnand %p471_p6, %p467_p1 }
  0x4d   : > { %475 = shalt.err (!%p472_p3)
}
  0x4e   : > { %342 = dma.vmem_to_hbm [thread:$0]  (%p604_p8), %s667_s19, 32, %s221_s28, %s209_s29  }
  0x4f PF: > { %s235_s24 = sand.u32 1, %s514_s9   ;;  %p721_p7 = scmp.ne.s32.totalorder %s718_s21, 0 }
  0x50   : > { %p722_p9 = scmp.ge.s32.totalorder %s534_s14, 2  ;;  %s236_s5 = scalar_lea.sflag [#allocation4], %s235_s24 }
  0x52   : > { %p353_p12 = pnand %p722_p9, %p721_p7 }
  0x54   : > { %p354_p13 = pneg %p353_p12 }
  0x56   : > { %509 = dma.done.wait (%p354_p13), %s236_s5, 32  }
  0x57   : > { %511 = vsyncadd (%p354_p13), %s236_s5, 4294967264  ;;  %s19_s14 = sadd.s32 1, %s534_s14   ;;  %s723_s9 = smov %s518_s10 }
  0x58   : > { %p16_p2 = scmp.ge.s32.totalorder %s19_s14, 4   ;;  %s724_s10 = smov %s522_s11 }
  0x59   : > { %s725_s11 = smov %s644_s15  ;;  %s726_s12 = smov %s530_s13 }
  0x5a   : > { %s727_s13 = smov %s729_s25  ;;  %18 = sbr.rel (!%p16_p2) target bundleno = 7 (0x7), region = 80 }
  0x5f   :  { %241 = vsyncpa [#allocation3], 1 }
  0x60   :  { %243 = vsyncpa [#allocation3 + $0x1], 1 }
  0x61   :  { %244 = vsyncpa [#allocation4], 1 }
  0x62   :  { %246 = vsyncpa [#allocation4 + $0x1], 1 }
  0x63   :  { %247 = vsyncpa [#allocation5], 1 }
  0x64   :  { %249 = vsyncpa [#allocation5 + $0x1], 1 }

</bundles_post_ra>
